<compile_context>
chip_gen: v7x
topology: tpu7x:2x2x1
jax: 0.10.0
libtpu: 0.0.40
codegen_flags: <defaults>
</compile_context>

<pallas_src>
import functools

import jax
import jax.numpy as jnp
from jax.experimental import pallas as pl
from jax.experimental.pallas import tpu as pltpu


def _rmsnorm_kernel(x_ref, w_ref, o_ref, *, eps, inv_hidden):
    # x_ref: (tile_rows, H), w_ref: (1, H) float32, o_ref: (tile_rows, H)
    x_in = x_ref[...]
    x = x_in.astype(jnp.float32)                                 # x.float()
    # sum * (1/H): XLU reduce + one VPU constant multiply (cheaper than mean)
    ms = jnp.sum(x * x, axis=-1, keepdims=True) * inv_hidden     # pow(2).mean(-1)
    inv = jax.lax.rsqrt(ms + eps)                                # rsqrt(. + eps)  (EUP)
    normed = (x * inv).astype(x_in.dtype)                        # .type_as(x)
    # output * weight (weight already f32; torch promotes the product to f32)
    out = normed.astype(jnp.float32) * w_ref[...]
    o_ref[...] = out.astype(o_ref.dtype)


def _sublane_multiple(dtype):
    itemsize = jnp.dtype(dtype).itemsize
    return {4: 8, 2: 16, 1: 32}.get(itemsize, 8)


def _pick_tile_rows(rows, hidden, in_dtype, out_dtype, target_block_bytes=4 << 20):
    """Pick a row-tile: ~target_block_bytes of f32 footprint per block, rounded
    to the sublane packing, >=4 grid steps when possible, limited pad waste."""
    sub = max(_sublane_multiple(in_dtype), _sublane_multiple(out_dtype))
    row_bytes_f32 = max(1, hidden * 4)  # intermediates / output are f32
    t = max(sub, (target_block_bytes // row_bytes_f32) // sub * sub)
    t = min(t, 2048)
    # Keep >=4 grid steps when the problem is big enough (megacore + pipelining).
    if rows >= 4 * sub:
        per_step = max(sub, (rows // 4) // sub * sub)
        t = min(t, per_step)
    # Never exceed the (sublane-padded) row count.
    t = min(t, pl.cdiv(rows, sub) * sub)
    t = max(sub, t)
    # Shrink tile while row-padding waste exceeds ~1/8 of the real rows.
    while t > sub and (pl.cdiv(rows, t) * t - rows) * 8 > rows:
        t = max(sub, (t // 2) // sub * sub)
    return t


def rms_norm(x, weight, eps=1e-6, tile_rows=None):
    """RMSNorm over the last axis of x, scaled by `weight` (shape [hidden])."""
    orig_shape = x.shape
    hidden = orig_shape[-1]
    rows = 1
    for d in orig_shape[:-1]:
        rows *= d

    # Output dtype follows torch promotion of (x-typed normed) * weight.
    out_dtype = jnp.promote_types(x.dtype, weight.dtype)

    x2d = x.reshape(rows, hidden)
    # Hoist the weight cast out of the kernel: pass it as f32 once.
    w2d = weight.astype(jnp.float32).reshape(1, hidden)

    if tile_rows is None:
        tile_rows = _pick_tile_rows(rows, hidden, x.dtype, out_dtype)

    # Ragged tail: pad rows up to a multiple of tile_rows (padded rows are
    # computed but discarded; eps keeps rsqrt finite on zero rows).
    padded_rows = pl.cdiv(rows, tile_rows) * tile_rows
    if padded_rows != rows:
        x2d = jnp.pad(x2d, ((0, padded_rows - rows), (0, 0)))

    grid = (padded_rows // tile_rows,)

    # VMEM budget: double-buffered in/out blocks + f32 intermediates + weight,
    # clamped to [32, 48] MiB (safe on v7x's 64 MiB/TC; raises v5e's default).
    in_block = tile_rows * hidden * jnp.dtype(x.dtype).itemsize
    out_block = tile_rows * hidden * jnp.dtype(out_dtype).itemsize
    f32_block = tile_rows * hidden * 4
    vmem_needed = 2 * (in_block + out_block) + 3 * f32_block + hidden * 4 + (1 << 20)
    vmem_limit = int(min(max(vmem_needed, 32 << 20), 48 << 20))

    out2d = pl.pallas_call(
        functools.partial(_rmsnorm_kernel, eps=eps, inv_hidden=1.0 / hidden),
        out_shape=jax.ShapeDtypeStruct((padded_rows, hidden), out_dtype),
        grid_spec=pltpu.PrefetchScalarGridSpec(
            num_scalar_prefetch=0,
            grid=grid,
            in_specs=[
                pl.BlockSpec((tile_rows, hidden), lambda i: (i, 0)),
                pl.BlockSpec((1, hidden), lambda i: (0, 0)),
            ],
            out_specs=pl.BlockSpec((tile_rows, hidden), lambda i: (i, 0)),
        ),
        compiler_params=pltpu.CompilerParams(
            dimension_semantics=("parallel",),
            vmem_limit_bytes=vmem_limit,
        ),
    )(x2d, w2d)

    if padded_rows != rows:
        out2d = out2d[:rows]
    return out2d.reshape(orig_shape[:-1] + (hidden,))


def rms_norm_reference(x, weight, eps=1e-6):
    xf = x.astype(jnp.float32)
    inv = jax.lax.rsqrt(jnp.mean(xf * xf, axis=-1, keepdims=True) + eps)
    normed = (xf * inv).astype(x.dtype)
    return normed.astype(jnp.float32) * weight.astype(jnp.float32)


if __name__ == "__main__":
    key = jax.random.PRNGKey(0)
    k1, k2, k3, k4 = jax.random.split(key, 4)

    # Case 1: module default (weight = ones), small shapes.
    batch, seq, hidden = 2, 8, 128
    x = jax.random.normal(k1, (batch, seq, hidden), dtype=jnp.float32)
    weight = jnp.ones((hidden,), dtype=jnp.float32)  # nn.Parameter(torch.ones)
    out = jax.block_until_ready(rms_norm(x, weight, eps=1e-6))
    ref = rms_norm_reference(x, weight, eps=1e-6)
    assert out.shape == x.shape, (out.shape, x.shape)
    assert jnp.allclose(out, ref, atol=1e-5, rtol=1e-5), "mismatch vs reference (ones)"

    # Case 2: non-trivial weight + ragged row count (exercises pad/slice path).
    x2 = jax.random.normal(k2, (3, 5, hidden), dtype=jnp.float32)
    w2 = 1.0 + 0.1 * jax.random.normal(k3, (hidden,), dtype=jnp.float32)
    out2 = jax.block_until_ready(rms_norm(x2, w2, eps=1e-6))
    ref2 = rms_norm_reference(x2, w2, eps=1e-6)
    assert out2.shape == x2.shape, (out2.shape, x2.shape)
    assert jnp.allclose(out2, ref2, atol=1e-5, rtol=1e-5), "mismatch vs reference (ragged)"

    # Case 3: larger row count, exercises the multi-step grid / pipelining path.
    x3 = jax.random.normal(k4, (4, 256, hidden), dtype=jnp.float32)
    out3 = jax.block_until_ready(rms_norm(x3, w2, eps=1e-6))
    ref3 = rms_norm_reference(x3, w2, eps=1e-6)
    assert out3.shape == x3.shape, (out3.shape, x3.shape)
    assert jnp.allclose(out3, ref3, atol=1e-5, rtol=1e-5), "mismatch vs reference (multi-block)"

    print("KERNEL_OK")
</pallas_src>

<mosaic_0001>
module attributes {stable_mosaic.version = 11 : i64} {
  func.func @_rmsnorm_kernel(%arg0: i32, %arg1: memref<16x128xf32, #tpu.memory_space<vmem>>, %arg2: memref<1x128xf32, #tpu.memory_space<vmem>>, %arg3: memref<16x128xf32, #tpu.memory_space<vmem>>) attributes {dimension_semantics = [#tpu.dimension_semantics<parallel>], iteration_bounds = array<i64: 1>, scalar_prefetch = 0 : i64, scratch_operands = 0 : i64, tpu.core_type = #tpu.core_type<tc>, window_params = [{transform_indices = @transform_0, window_bounds = array<i64: 16, 128>}, {pipeline_mode = #tpu.pipeline_mode<synchronous>, transform_indices = @transform_1, window_bounds = array<i64: 1, 128>}, {transform_indices = @transform_2, window_bounds = array<i64: 16, 128>}]} {
    %c0 = arith.constant 0 : index
    %c0_0 = arith.constant 0 : index
    %0 = vector.load %arg1[%c0, %c0_0] : memref<16x128xf32, #tpu.memory_space<vmem>>, vector<16x128xf32>
    %1 = arith.mulf %0, %0 : vector<16x128xf32>
    %cst = arith.constant dense<0.000000e+00> : vector<16xf32>
    %2 = vector.multi_reduction <add>, %1, %cst [1] : vector<16x128xf32> to vector<16xf32>
    %3 = vector.shape_cast %2 : vector<16xf32> to vector<16x1xf32>
    %cst_1 = arith.constant 7.812500e-03 : f32
    %4 = vector.broadcast %cst_1 : f32 to vector<16x1xf32>
    %5 = arith.mulf %3, %4 : vector<16x1xf32>
    %cst_2 = arith.constant 9.99999997E-7 : f32
    %6 = vector.broadcast %cst_2 : f32 to vector<16x1xf32>
    %7 = arith.addf %5, %6 : vector<16x1xf32>
    %8 = math.rsqrt %7 : vector<16x1xf32>
    %9 = vector.broadcast %8 : vector<16x1xf32> to vector<16x128xf32>
    %10 = arith.mulf %0, %9 : vector<16x128xf32>
    %c0_3 = arith.constant 0 : index
    %c0_4 = arith.constant 0 : index
    %11 = vector.load %arg2[%c0_3, %c0_4] : memref<1x128xf32, #tpu.memory_space<vmem>>, vector<1x128xf32>
    %12 = vector.broadcast %11 : vector<1x128xf32> to vector<16x128xf32>
    %13 = arith.mulf %10, %12 : vector<16x128xf32>
    %c0_5 = arith.constant 0 : index
    %c0_6 = arith.constant 0 : index
    %14 = vector.load %arg3[%c0_5, %c0_6] : memref<16x128xf32, #tpu.memory_space<vmem>>, vector<16x128xf32>
    tpu.vector_store %arg3[%c0_5, %c0_6], %13 {strides = array<i32>} : memref<16x128xf32, #tpu.memory_space<vmem>>, vector<16x128xf32>,
    return
  }
  func.func @transform_0(%arg0: i32) -> (i32, i32) {
    %c0_i32 = arith.constant 0 : i32
    %c0_i32_0 = arith.constant 0 : i32
    return %arg0, %c0_i32 : i32, i32
  }
  func.func @transform_1(%arg0: i32) -> (i32, i32) {
    %c0_i32 = arith.constant 0 : i32
    %c0_i32_0 = arith.constant 0 : i32
    %c0_i32_1 = arith.constant 0 : i32
    return %c0_i32, %c0_i32_0 : i32, i32
  }
  func.func @transform_2(%arg0: i32) -> (i32, i32) {
    %c0_i32 = arith.constant 0 : i32
    %c0_i32_0 = arith.constant 0 : i32
    return %arg0, %c0_i32 : i32, i32
  }
}

</mosaic_0001>

<bundles_post_ra>
// kernel: tpu_custom_call.1
= control target key start
LH: loop header
LB: loop body
LE: loop exit
PB: predicated region body
PF: predicated region fallthrough
CT: control target
= control target key end

     0   :  { %7 = vsyncpa [#allocation3], 0  ;;  %s179_s0 = inlined_call_operand.hbm [shape: f32[16,128], index: 0, kind: input, shape index: {}]   ;;  %s180_s1 = inlined_call_operand.vmem [shape: f32[1,128], index: 1, kind: input, shape index: {}]   ;;  %s181_s2 = inlined_call_operand.hbm [shape: f32[16,128], index: 2, kind: output, shape index: {}]  }
   0x1   :  { %8 = vsyncpa [#allocation4], 0  ;;  %s127_s9 = smov [#allocation2]   ;;  %s79_s13 = scalar_lea.hbm %s179_s0, 256 }
   0x2   :  { %s14_s10 = sshll.u32 %s127_s9, 4  ;;  %p80_p0 = scmp.ne.s32.totalorder %s179_s0, %s79_s13  ;;  %s15_s10 = int_to_ptr.vmem [resolvable:$true] %s14_s10 }
   0x3   :  { %p83_p1 = scmp.lt.u32.totalorder %s79_s13, %s179_s0 }
   0x5   :  { %p85_p2 = pnand %p83_p1, %p80_p0 }
   0x7   :  { %88 = shalt.err (!%p85_p2)
}
   0x8   :  { %s89_s18 = scalar_lea.vmem %s15_s10, 256  ;;  %p94_p4 = scmp.lt.s32.totalorder %s15_s10, %s15_s10 }
   0x9   :  { %p90_p3 = scmp.ne.s32.totalorder %s15_s10, %s89_s18  ;;  %p95_p5 = scmp.lt.s32.totalorder %s89_s18, %s89_s18 }
   0xb   :  { %p96_p6 = por %p95_p5, %p94_p4 }
   0xd   :  { %p97_p7 = pnand %p96_p6, %p90_p3 }
   0xf   :  { %100 = shalt.err (!%p97_p7)
}
  0x10   :  { %s128_s19 = smov 128   ;;  %s129_s20 = smov 8  }
  0x11   :  { %20 = dma.hbm_to_vmem [thread:$0]  %s179_s0, 256, %s15_s10, [#allocation3], %s128_s19, %s128_s19, %s129_s20  }
  0x12   :  { %123 = dma.done.wait [#allocation3], 256  }
  0x13   :  { %124 = vsyncadd [#allocation3], 4294967040  ;;  %v26_v0 = vld [vmem:[#allocation2] sm:$0xff]  ;;  %v27_v1 = vld [vmem:[#allocation2 + $0x8] sm:$0xff]  ;;  %s130_s0 = smov [#allocation5]  }
  0x14   :  { %v28_v2 = vmul.f32 %v26_v0, %v26_v0  ;;  %v29_v3 = vmul.f32 %v27_v1, %v27_v1  ;;  %v70_v11 = vld [vmem:[%s180_s1] ss:$0 sm:$0xff]  ;;  %s58_s25 = sshll.u32 %s130_s0, 4  ;;  %s59_s25 = int_to_ptr.vmem [resolvable:$true] %s58_s25 }
  0x15   :  { %s101_s26 = scalar_lea.vmem %s59_s25, 256  ;;  %p106_p9 = scmp.lt.s32.totalorder %s59_s25, %s59_s25 }
  0x16   :  { %30 = vadd.xlane.f32.xlu0 %v28_v2  ;;  %p102_p8 = scmp.ne.s32.totalorder %s59_s25, %s101_s26  ;;  %p107_p10 = scmp.lt.s32.totalorder %s101_s26, %s101_s26 }
  0x18   :  { %p108_p11 = por %p107_p10, %p106_p9 }
  0x1a   :  { %32 = vadd.xlane.f32.xlu0 %v29_v3  ;;  %p109_p12 = pnand %p108_p11, %p102_p8 }
  0xa3   :  { %v31_v4 = vpop.xlane.xlu0 %30 }
  0xa4   :  { %v34_v5 = vmul.f32 0.0078125, %v31_v4 }
  0xa6   :  { %v36_v6 = vadd.f32 1e-06, %v34_v5 }
  0xa7   :  { %v33_v7 = vpop.xlane.xlu0 %32 }
  0xa8   :  { %75 = vrsqrt.f32 %v36_v6  ;;  %v35_v8 = vmul.f32 0.0078125, %v33_v7 }
  0xaa   :  { %v37_v9 = vadd.f32 1e-06, %v35_v8 }
  0xac   :  { %77 = vrsqrt.f32 %v37_v9 }
  0xb2   :  { %v76_v10 = vpop.eup %75 }
  0xb3   :  { %v40_v12 = vmul.f32 %v76_v10, %v26_v0 }
  0xb5   :  { %v49_v13 = vmul.f32 %v70_v11, %v40_v12 }
  0xb6   :  { %v78_v14 = vpop.eup %77 }
  0xb7   :  { %v41_v15 = vmul.f32 %v78_v14, %v27_v1  ;;  %51 = vst [vmem:[#allocation5] sm:$0xff] %v49_v13 }
  0xb9   :  { %v50_v16 = vmul.f32 %v70_v11, %v41_v15 }
  0xbb   :  { %52 = vst [vmem:[#allocation5 + $0x8] sm:$0xff] %v50_v16 }
  0xbc   :  { %112 = shalt.err (!%p109_p12)
}
  0xbd   :  { %s113_s1 = scalar_lea.hbm %s181_s2, 256 }
  0xbe   :  { %p114_p13 = scmp.ne.s32.totalorder %s181_s2, %s113_s1  ;;  %p117_p0 = scmp.lt.u32.totalorder %s113_s1, %s181_s2 }
  0xc0   :  { %p119_p1 = pnand %p117_p0, %p114_p13 }
  0xc2   :  { %122 = shalt.err (!%p119_p1)
}
  0xc3   :  { %64 = dma.vmem_to_hbm [thread:$0]  %s59_s25, 256, %s181_s2, [#allocation4], %s128_s19, %s128_s19, %s129_s20  }
  0xc4   :  { %125 = dma.done.wait [#allocation4], 256  }
  0xc5   :  { %126 = vsyncadd [#allocation4], 4294967040 }
  0xc6   :  { %68 = vsyncpa [#allocation3], 1 }
  0xc7   :  { %69 = vsyncpa [#allocation4], 1 }

</bundles_post_ra>
